<compile_context>
chip_gen: v7x
topology: tpu7x:2x2x1
jax: 0.10.0
libtpu: 0.0.40
codegen_flags: <defaults>
</compile_context>

<pallas_src>
import jax
import jax.numpy as jnp
from jax.experimental import pallas as pl
from jax.experimental.pallas import tpu as pltpu

KH = KW = 3


def _round_up(x, m):
    return (x + m - 1) // m * m


def prepare_params(w_t, bias, *, cin, cout, width):
    """One-time weight prep (hoisted out of the per-call path).

    w_t:  (Cin, Cout, 3, 3) ConvTranspose2d weight layout.
    bias: (Cout,)
    Returns:
      B2:        (Kpad, Lout) f32 banded weight matrix, Kpad = roundup(3*Cin*(W+2), 128)
      bias_lane: (1, Lout) f32 co-major bias (Lout = Cout*W).
    """
    Lin = cin * (width + 2)
    Lout = cout * width
    K = KH * Lin
    Kpad = _round_up(K, 128)

    # ConvTranspose(stride=1, pad=1) == Conv(pad=1) with flipped kernel and swapped
    # channel axes:  wt[kh, kw, ci, co] = w_t[ci, co, 2-kh, 2-kw]
    wt = jnp.transpose(w_t[:, :, ::-1, ::-1], (2, 3, 0, 1)).astype(jnp.float32)

    # Banded per-row weight matrices, kh folded (stacked) into the contraction dim:
    #   B[kh*Lin + ci*(W+2)+wp, co*W+w] = wt[kh, wp-w, ci, co]   for 0 <= wp-w < KW
    rows = []
    for kh in range(KH):
        Bk = jnp.zeros((cin, width + 2, cout, width), jnp.float32)
        for kw in range(KW):
            E = jnp.eye(width + 2, width, k=-kw, dtype=jnp.float32)  # E[w+kw, w] = 1
            Bk = Bk + jnp.einsum('ic,uv->iucv', wt[kh, kw], E)
        rows.append(Bk.reshape(Lin, Lout))
    B2 = jnp.concatenate(rows, axis=0)              # (3*Lin, Lout)
    B2 = jnp.pad(B2, ((0, Kpad - K), (0, 0)))       # lane-pad contraction dim

    bias_lane = jnp.repeat(bias.astype(jnp.float32), width).reshape(1, Lout)
    return B2, bias_lane


def _fused_kernel(x_ref, w_ref, b_ref, o_ref):
    # x_ref: (M, Kpad)   w_ref: (Kpad, Lout)   b_ref: (1, Lout)   o_ref: (M, Lout)
    acc = jnp.dot(x_ref[...], w_ref[...], preferred_element_type=jnp.float32)
    acc = acc + b_ref[...]
    # leaky-relu(0.1): one vmul + one vmax
    o_ref[...] = jnp.maximum(acc, acc * 0.1)


@jax.jit
def conv_transpose_leakyrelu(x_nchw, B2, bias_lane):
    """x_nchw: (N, Cin, H, W) f32. Returns (N, Cout, H, W) f32."""
    N, Cin, H, W = x_nchw.shape
    Lin = Cin * (W + 2)
    K = KH * Lin
    Kpad, Lout = B2.shape
    Cout = Lout // W
    M = N * H

    # Input prep: pad spatially, fold channels into lanes, fold kh into K.
    xp = jnp.pad(x_nchw.astype(jnp.float32), ((0, 0), (0, 0), (1, 1), (1, 1)))
    x3 = jnp.transpose(xp, (0, 2, 1, 3)).reshape(N, H + 2, Lin)          # (N, H+2, Lin)
    x2 = jnp.concatenate([x3[:, kh:kh + H, :] for kh in range(KH)], axis=-1)
    x2 = x2.reshape(M, K)
    x2 = jnp.pad(x2, ((0, 0), (0, Kpad - K)))                            # (M, Kpad)

    flops = 2 * M * Kpad * Lout
    bytes_accessed = 4 * (M * Kpad + Kpad * Lout + Lout + M * Lout)

    out2 = pl.pallas_call(
        _fused_kernel,
        out_shape=jax.ShapeDtypeStruct((M, Lout), jnp.float32),
        in_specs=[
            pl.BlockSpec(memory_space=pltpu.MemorySpace.VMEM),
            pl.BlockSpec(memory_space=pltpu.MemorySpace.VMEM),
            pl.BlockSpec(memory_space=pltpu.MemorySpace.VMEM),
        ],
        out_specs=pl.BlockSpec(memory_space=pltpu.MemorySpace.VMEM),
        cost_estimate=pl.CostEstimate(
            flops=flops, transcendentals=0, bytes_accessed=bytes_accessed),
    )(x2, B2, bias_lane)

    # (N*H, Cout*W) -> (N, Cout, H, W)   (co-major lanes make this exact)
    return jnp.transpose(out2.reshape(N, H, Cout, W), (0, 2, 1, 3))


def _reference(x_nchw, w_t, bias):
    """Pure-JAX reference: ConvTranspose2d(stride=1, pad=1) + leaky-relu(0.1)."""
    w_conv = jnp.transpose(w_t[:, :, ::-1, ::-1], (1, 0, 2, 3))   # (Cout, Cin, 3, 3)
    y = jax.lax.conv_general_dilated(
        x_nchw, w_conv, window_strides=(1, 1), padding=((1, 1), (1, 1)),
        dimension_numbers=("NCHW", "OIHW", "NCHW"),
    ) + bias.reshape(1, -1, 1, 1)
    return jnp.where(y > 0.0, y, 0.1 * y)


if __name__ == "__main__":
    key = jax.random.PRNGKey(0)
    k_x, k_w, k_b = jax.random.split(key, 3)

    N, Cin, Cout, H, W = 2, 3, 8, 16, 16     # Cout*W = 128 lane-dense output
    x = jax.random.normal(k_x, (N, Cin, H, W), dtype=jnp.float32)
    # ConvTranspose2d weight layout: (in_channels, out_channels, kh, kw)
    fan = Cin * 3 * 3
    bound = 1.0 / (fan ** 0.5)
    w_t = jax.random.uniform(k_w, (Cin, Cout, 3, 3), minval=-bound, maxval=bound,
                             dtype=jnp.float32)
    bias = jax.random.uniform(k_b, (Cout,), minval=-bound, maxval=bound,
                              dtype=jnp.float32)

    # One-time weight prep (would be cached alongside the module's parameters).
    B2, bias_lane = prepare_params(w_t, bias, cin=Cin, cout=Cout, width=W)
    B2 = jax.block_until_ready(B2)
    bias_lane = jax.block_until_ready(bias_lane)

    out = jax.block_until_ready(conv_transpose_leakyrelu(x, B2, bias_lane))
    ref = jax.block_until_ready(_reference(x, w_t, bias))

    assert out.shape == (N, Cout, H, W)
    assert jnp.allclose(out, ref, atol=2e-5, rtol=2e-5)

    print("KERNEL_OK")
</pallas_src>

<mosaic_0001>
module attributes {stable_mosaic.version = 11 : i64} {
  func.func @_fused_kernel(%arg0: memref<32x256xf32, #tpu.memory_space<vmem>>, %arg1: memref<256x128xf32, #tpu.memory_space<vmem>>, %arg2: memref<1x128xf32, #tpu.memory_space<vmem>>, %arg3: memref<32x128xf32, #tpu.memory_space<vmem>>) attributes {dimension_semantics = [], scalar_prefetch = 0 : i64, scratch_operands = 0 : i64, tpu.core_type = #tpu.core_type<tc>} {
    %c0 = arith.constant 0 : index
    %c0_0 = arith.constant 0 : index
    %0 = vector.load %arg0[%c0, %c0_0] : memref<32x256xf32, #tpu.memory_space<vmem>>, vector<32x256xf32>
    %c0_1 = arith.constant 0 : index
    %c0_2 = arith.constant 0 : index
    %1 = vector.load %arg1[%c0_1, %c0_2] : memref<256x128xf32, #tpu.memory_space<vmem>>, vector<256x128xf32>
    %cst = arith.constant dense<0.000000e+00> : vector<32x128xf32>
    %2 = tpu.matmul %0, %1, %cst {dimension_numbers = #tpu.dot_dimension_numbers<[1], [0], [0], [1], [0, 0, 1, 1], [], []>} : vector<32x256xf32>, vector<256x128xf32>, vector<32x128xf32> -> vector<32x128xf32>
    %c0_3 = arith.constant 0 : index
    %c0_4 = arith.constant 0 : index
    %3 = vector.load %arg2[%c0_3, %c0_4] : memref<1x128xf32, #tpu.memory_space<vmem>>, vector<1x128xf32>
    %4 = vector.broadcast %3 : vector<1x128xf32> to vector<32x128xf32>
    %5 = arith.addf %2, %4 : vector<32x128xf32>
    %cst_5 = arith.constant 1.000000e-01 : f32
    %6 = vector.broadcast %cst_5 : f32 to vector<32x128xf32>
    %7 = arith.mulf %5, %6 : vector<32x128xf32>
    %8 = arith.maximumf %5, %7 : vector<32x128xf32>
    %c0_6 = arith.constant 0 : index
    %c0_7 = arith.constant 0 : index
    %9 = vector.load %arg3[%c0_6, %c0_7] : memref<32x128xf32, #tpu.memory_space<vmem>>, vector<32x128xf32>
    tpu.vector_store %arg3[%c0_6, %c0_7], %8 {strides = array<i32>} : memref<32x128xf32, #tpu.memory_space<vmem>>, vector<32x128xf32>,
    return
  }
}

</mosaic_0001>

<bundles_post_ra>
// kernel: conv_transpose_leakyrelu.1
= control target key start
LH: loop header
LB: loop body
LE: loop exit
PB: predicated region body
PF: predicated region fallthrough
CT: control target
= control target key end

     0   :  { %s410_s1 = inlined_call_operand.vmem [shape: f32[256,128], index: 1, kind: input, shape index: {}]   ;;  %s411_s0 = inlined_call_operand.vmem [shape: f32[32,256], index: 0, kind: input, shape index: {}]   ;;  %s412_s2 = inlined_call_operand.vmem [shape: f32[1,128], index: 2, kind: input, shape index: {}]   ;;  %s413_s3 = inlined_call_operand.vmem [shape: f32[32,128], index: 3, kind: output, shape index: {}]  }
   0x1   :  { %v38_v0 = vld [vmem:[%s410_s1 + $0x80] sm:$0xff]  ;;  %v39_v1 = vld [vmem:[%s410_s1 + $0x88] sm:$0xff]  ;;  %v40_v5 = vld [vmem:[%s410_s1 + $0x90] sm:$0xff] }
   0x2   :  { %v22_v2 = vld [vmem:[%s410_s1] sm:$0xff]  ;;  %v207_v3 = vpack.c.bf16 %v39_v1, %v38_v0  ;;  %v23_v4 = vld [vmem:[%s410_s1 + $0x8] sm:$0xff]  ;;  %v41_v6 = vld [vmem:[%s410_s1 + $0x98] sm:$0xff] }
   0x3   :  { %v209_v7 = vpack.c.bf16 %v23_v4, %v22_v2  ;;  %v211_v8 = vpack.c.bf16 %v41_v6, %v40_v5  ;;  %v24_v9 = vld [vmem:[%s410_s1 + $0x10] sm:$0xff]  ;;  %v25_v10 = vld [vmem:[%s410_s1 + $0x18] sm:$0xff]  ;;  %v42_v11 = vld [vmem:[%s410_s1 + $0xa0] sm:$0xff] }
   0x4   :  { %208 = vmatprep.subr.bf16.mxu0 %v207_v3  ;;  %239 = vmatprep.subr.bf16.mxu1 %v207_v3  ;;  %v43_v12 = vld [vmem:[%s410_s1 + $0xa8] sm:$0xff]  ;;  %v213_v13 = vpack.c.bf16 %v25_v10, %v24_v9  ;;  %v26_v15 = vld [vmem:[%s410_s1 + $0x20] sm:$0xff]  ;;  %v44_v17 = vld [vmem:[%s410_s1 + $0xb0] sm:$0xff] }
   0x5   :  { %210 = vmatpush3.bf16.msra.mxu0 %v209_v7  ;;  %247 = vmatpush3.bf16.msra.mxu1 %v209_v7  ;;  %v215_v14 = vpack.c.bf16 %v43_v12, %v42_v11  ;;  %v27_v16 = vld [vmem:[%s410_s1 + $0x28] sm:$0xff]  ;;  %v45_v18 = vld [vmem:[%s410_s1 + $0xb8] sm:$0xff]  ;;  %v28_v21 = vld [vmem:[%s410_s1 + $0x30] sm:$0xff] }
   0x6   :  { %212 = vmatprep.subr.bf16.mxu0 %v211_v8  ;;  %240 = vmatprep.subr.bf16.mxu1 %v211_v8  ;;  %v217_v19 = vpack.c.bf16 %v27_v16, %v26_v15  ;;  %v219_v20 = vpack.c.bf16 %v45_v18, %v44_v17  ;;  %v29_v22 = vld [vmem:[%s410_s1 + $0x38] sm:$0xff]  ;;  %v46_v23 = vld [vmem:[%s410_s1 + $0xc0] sm:$0xff]  ;;  %v47_v24 = vld [vmem:[%s410_s1 + $0xc8] sm:$0xff] }
   0x7   :  { %v15_v25 = vld [vmem:[%s411_s0 + $0x8] sm:$0xff]  ;;  %v221_v27 = vpack.c.bf16 %v29_v22, %v28_v21  ;;  %v223_v28 = vpack.c.bf16 %v47_v24, %v46_v23  ;;  %v30_v29 = vld [vmem:[%s410_s1 + $0x40] sm:$0xff]  ;;  %v48_v31 = vld [vmem:[%s410_s1 + $0xd0] sm:$0xff] }
   0x8   :  { %125 = vmatprep.mubr.f32.mxu0 %v15_v25  ;;  %v19_v26 = vld [vmem:[%s411_s0 + $0x28] sm:$0xff]  ;;  %v49_v32 = vld [vmem:[%s410_s1 + $0xd8] sm:$0xff]  ;;  %v32_v35 = vld [vmem:[%s410_s1 + $0x50] sm:$0xff] }
   0x9   :  { %214 = vmatpush3.bf16.msra.mxu0 %v213_v13  ;;  %248 = vmatpush3.bf16.msra.mxu1 %v213_v13  ;;  %v31_v30 = vld [vmem:[%s410_s1 + $0x48] sm:$0xff]  ;;  %v227_v34 = vpack.c.bf16 %v49_v32, %v48_v31  ;;  %v33_v36 = vld [vmem:[%s410_s1 + $0x58] sm:$0xff]  ;;  %v50_v37 = vld [vmem:[%s410_s1 + $0xe0] sm:$0xff] }
   0xa   :  { %216 = vmatprep.subr.bf16.mxu0 %v215_v14  ;;  %241 = vmatprep.subr.bf16.mxu1 %v215_v14  ;;  %v225_v33 = vpack.c.bf16 %v31_v30, %v30_v29  ;;  %v51_v38 = vld [vmem:[%s410_s1 + $0xe8] sm:$0xff]  ;;  %v229_v39 = vpack.c.bf16 %v33_v36, %v32_v35  ;;  %v34_v41 = vld [vmem:[%s410_s1 + $0x60] sm:$0xff]  ;;  %v52_v43 = vld [vmem:[%s410_s1 + $0xf0] sm:$0xff] }
   0xb   :  { %135 = vmatprep.mubr.f32.mxu1 %v19_v26  ;;  %v231_v40 = vpack.c.bf16 %v51_v38, %v50_v37  ;;  %v35_v42 = vld [vmem:[%s410_s1 + $0x68] sm:$0xff]  ;;  %v53_v44 = vld [vmem:[%s410_s1 + $0xf8] sm:$0xff]  ;;  %v36_v47 = vld [vmem:[%s410_s1 + $0x70] sm:$0xff] }
   0xc   :  { %v233_v45 = vpack.c.bf16 %v35_v42, %v34_v41  ;;  %v235_v46 = vpack.c.bf16 %v53_v44, %v52_v43  ;;  %v37_v48 = vld [vmem:[%s410_s1 + $0x78] sm:$0xff]  ;;  %v14_v50 = vld [vmem:[%s411_s0] sm:$0xff]  ;;  %v16_v54 = vld [vmem:[%s411_s0 + $0x10] sm:$0xff] }
   0xd   :  { %218 = vmatpush3.bf16.msra.mxu0 %v217_v19  ;;  %249 = vmatpush3.bf16.msra.mxu1 %v217_v19  ;;  %v237_v49 = vpack.c.bf16 %v37_v48, %v36_v47  ;;  %v18_v51 = vld [vmem:[%s411_s0 + $0x20] sm:$0xff]  ;;  %v17_v52 = vld [vmem:[%s411_s0 + $0x18] sm:$0xff]  ;;  %v20_v55 = vld [vmem:[%s411_s0 + $0x30] sm:$0xff] }
   0xe   :  { %220 = vmatprep.subr.bf16.mxu0 %v219_v20  ;;  %242 = vmatprep.subr.bf16.mxu1 %v219_v20  ;;  %v21_v53 = vld [vmem:[%s411_s0 + $0x38] sm:$0xff]  ;;  %v162_v58 = vld [vmem:[%s412_s2] ss:$0 sm:$0xff] }
  0x11   :  { %222 = vmatpush3.bf16.msra.mxu0 %v221_v27  ;;  %250 = vmatpush3.bf16.msra.mxu1 %v221_v27 }
  0x12   :  { %224 = vmatprep.subr.bf16.mxu0 %v223_v28  ;;  %243 = vmatprep.subr.bf16.mxu1 %v223_v28 }
  0x15   :  { %226 = vmatpush3.bf16.msra.mxu0 %v225_v33  ;;  %251 = vmatpush3.bf16.msra.mxu1 %v225_v33 }
  0x16   :  { %228 = vmatprep.subr.bf16.mxu0 %v227_v34  ;;  %244 = vmatprep.subr.bf16.mxu1 %v227_v34 }
  0x19   :  { %230 = vmatpush3.bf16.msra.mxu0 %v229_v39  ;;  %252 = vmatpush3.bf16.msra.mxu1 %v229_v39 }
  0x1a   :  { %232 = vmatprep.subr.bf16.mxu0 %v231_v40  ;;  %245 = vmatprep.subr.bf16.mxu1 %v231_v40 }
  0x1d   :  { %234 = vmatpush3.bf16.msra.mxu0 %v233_v45  ;;  %253 = vmatpush3.bf16.msra.mxu1 %v233_v45 }
  0x1e   :  { %236 = vmatprep.subr.bf16.mxu0 %v235_v46  ;;  %246 = vmatprep.subr.bf16.mxu1 %v235_v46 }
  0x21   :  { %238 = vmatpush3.bf16.msra.mxu0 %v237_v49  ;;  %254 = vmatpush3.bf16.msra.mxu1 %v237_v49 }
  0x24   :  { %126 = vmatmul.mubr.f32.vlgmr.msra.gmra.mrb[0].mxu0 %v14_v50  ;;  %136 = vmatmul.mubr.f32.vlgmr.msra.gmra.mrb[0].mxu1 %v18_v51 }
  0x25   :  { %130 = vmatprep.mubr.f32.mxu0 %v17_v52  ;;  %140 = vmatprep.mubr.f32.mxu1 %v21_v53 }
  0x28   :  { %131 = vmatmul.mubr.f32.gmra.mrb[2].mxu0 %v16_v54  ;;  %141 = vmatmul.mubr.f32.gmra.mrb[2].mxu1 %v20_v55 }
  0xf7   :  { %v195_v56 = vpop.f32.mrb[0].mxu0  ;;  %v201_v57 = vpop.f32.mrb[0].mxu1 }
  0xf8   :  { %v196_v59 = vpop.f32.mrb[1].mxu0  ;;  %v202_v60 = vpop.f32.mrb[1].mxu1 }
  0xf9   :  { %v197_v61 = vadd.f32 %v196_v59, %v195_v56  ;;  %v203_v62 = vadd.f32 %v202_v60, %v201_v57 }
  0xfb   :  { %v128_v63 = vadd.f32 %v197_v61, %v162_v58  ;;  %v138_v0 = vadd.f32 %v203_v62, %v162_v58  ;;  %v198_v1 = vpop.f32.mrb[2].mxu0  ;;  %v204_v2 = vpop.f32.mrb[2].mxu1 }
  0xfc   :  { %v199_v3 = vpop.f32.mrb[3].mxu0  ;;  %v205_v4 = vpop.f32.mrb[3].mxu1 }
  0xfd   :  { %v146_v5 = vmul.f32 0.1, %v128_v63  ;;  %v148_v6 = vmul.f32 0.1, %v138_v0  ;;  %v200_v7 = vadd.f32 %v199_v3, %v198_v1  ;;  %v206_v8 = vadd.f32 %v205_v4, %v204_v2 }
  0xff   :  { %v150_v9 = vmax.f32 %v128_v63, %v146_v5  ;;  %v152_v10 = vmax.f32 %v138_v0, %v148_v6  ;;  %v133_v11 = vadd.f32 %v200_v7, %v162_v58  ;;  %v143_v12 = vadd.f32 %v206_v8, %v162_v58 }
 0x101   :  { %154 = vst [vmem:[%s413_s3] sm:$0xff] %v150_v9  ;;  %156 = vst [vmem:[%s413_s3 + $0x10] sm:$0xff] %v152_v10  ;;  %v147_v13 = vmul.f32 0.1, %v133_v11  ;;  %v149_v14 = vmul.f32 0.1, %v143_v12 }
 0x103   :  { %v151_v15 = vmax.f32 %v133_v11, %v147_v13  ;;  %v153_v16 = vmax.f32 %v143_v12, %v149_v14 }
 0x105   :  { %155 = vst [vmem:[%s413_s3 + $0x8] sm:$0xff] %v151_v15  ;;  %157 = vst [vmem:[%s413_s3 + $0x18] sm:$0xff] %v153_v16 }

</bundles_post_ra>
